<compile_context>
chip_gen: v6e
topology: v6e:2x2x1
jax: 0.10.0
libtpu: 0.0.40
codegen_flags: <defaults>
</compile_context>

<pallas_src>
import jax
import jax.numpy as jnp
from jax.experimental import pallas as pl
from jax.experimental.pallas import tpu as pltpu


def residual_block_kernel(x_ref, w_ref, b_ref, o_ref):
    """Fused linear + bias + residual add + ReLU on one [tm, H] row tile."""
    x = x_ref[...]                                                   # (tm, H)
    # MXU matmul with f32 accumulation (x/w may be f32 or bf16).
    y = jnp.dot(x, w_ref[...], preferred_element_type=jnp.float32)  # (tm, H) f32
    y = y + b_ref[...].astype(jnp.float32)                          # bias (1, H) broadcast
    # Residual add kept in f32 (explicit upcast matters only on the bf16 path).
    y = y + x.astype(jnp.float32)
    o_ref[...] = jnp.maximum(y, 0.0).astype(o_ref.dtype)            # ReLU (VPU)


def _round_up(n, m):
    return ((n + m - 1) // m) * m


def residual_block(x, w_t, b, *, tm=512, use_bf16=False):
    """out = relu(x + x @ w_t + b).

    x   : (B, S, H)
    w_t : (H, H)  -- transpose of the nn.Linear weight (i.e. W.T)
    b   : (H,)
    tm  : row tile (multiple of 8); clamped for small problems.
    use_bf16 : cast matmul operands to bf16 (numerics tradeoff vs f32 ref).
    """
    B, S, H = x.shape
    M = B * S
    out_dtype = x.dtype

    # Clamp the row tile for tiny problems -> single block, no pipelining.
    tm_eff = min(int(tm), _round_up(M, 8))
    tm_eff = _round_up(tm_eff, 8)
    m_pad = _round_up(M, tm_eff)
    grid_m = pl.cdiv(m_pad, tm_eff)

    x2 = x.reshape(M, H)
    if m_pad != M:
        x2 = jnp.pad(x2, ((0, m_pad - M), (0, 0)))

    if use_bf16:
        x2 = x2.astype(jnp.bfloat16)
        w_t = w_t.astype(jnp.bfloat16)
    b2 = b.reshape(1, H).astype(jnp.float32)

    # VMEM budget: x double-buffered, out double-buffered (f32), weight + bias
    # single-buffered.  Generous 2x headroom, floored at 32 MiB, capped at
    # 64 MiB (v7x physical VMEM per TC).
    itm_x = jnp.dtype(x2.dtype).itemsize
    itm_w = jnp.dtype(w_t.dtype).itemsize
    needed = (2 * tm_eff * H * itm_x          # x, double-buffered
              + 2 * tm_eff * H * 4            # out (f32), double-buffered
              + H * H * itm_w                 # resident weight
              + 8 * H * 4)                    # bias (+ padding slack)
    vmem_limit = int(min(max(2 * needed, 32 * 1024 * 1024), 64 * 1024 * 1024))

    out2 = pl.pallas_call(
        residual_block_kernel,
        out_shape=jax.ShapeDtypeStruct((m_pad, H), out_dtype),
        grid_spec=pltpu.PrefetchScalarGridSpec(
            num_scalar_prefetch=0,
            grid=(grid_m,),
            in_specs=[
                # Streaming activation tile.
                pl.BlockSpec((tm_eff, H), lambda i: (i, 0)),
                # Resident weight / bias: constant index_map -> fetched once,
                # single-buffered (no wasted second VMEM buffer).
                pl.BlockSpec((H, H), lambda i: (0, 0),
                             pipeline_mode=pl.Buffered(1)),
                pl.BlockSpec((1, H), lambda i: (0, 0),
                             pipeline_mode=pl.Buffered(1)),
            ],
            out_specs=pl.BlockSpec((tm_eff, H), lambda i: (i, 0)),
        ),
        compiler_params=pltpu.CompilerParams(
            dimension_semantics=("parallel",),
            vmem_limit_bytes=vmem_limit),
    )(x2, w_t, b2)

    if m_pad != M:
        out2 = out2[:M]
    return out2.reshape(B, S, H)


def residual_block_ref(x, w_t, b):
    """Pure-JAX reference matching the PyTorch forward."""
    return jnp.maximum(x + (x @ w_t + b), 0.0)


if __name__ == "__main__":
    key = jax.random.PRNGKey(0)
    kx, kw, kb, kx2, kx3 = jax.random.split(key, 5)

    H = 128
    bound = 1.0 / jnp.sqrt(H)
    # nn.Linear-style params: W is (out, in); we pass W.T of shape (H, H).
    w_t = jax.random.uniform(kw, (H, H), minval=-bound, maxval=bound,
                             dtype=jnp.float32)
    b = jax.random.uniform(kb, (H,), minval=-bound, maxval=bound,
                           dtype=jnp.float32)

    # 1) Tiny problem (single block, no pipelining): batch=2, seq=8, hidden=128.
    x = jax.random.normal(kx, (2, 8, H), dtype=jnp.float32)
    out = jax.block_until_ready(residual_block(x, w_t, b))
    ref = residual_block_ref(x, w_t, b)
    assert out.shape == x.shape
    assert jnp.allclose(out, ref, atol=1e-5, rtol=1e-5)

    # 2) Non-divisible row count (exercises padding path): batch=3, seq=7.
    x_odd = jax.random.normal(kx2, (3, 7, H), dtype=jnp.float32)
    out_odd = jax.block_until_ready(residual_block(x_odd, w_t, b))
    ref_odd = residual_block_ref(x_odd, w_t, b)
    assert out_odd.shape == x_odd.shape
    assert jnp.allclose(out_odd, ref_odd, atol=1e-5, rtol=1e-5)

    # 3) Multi-step grid with resident (single-buffered) weight: tm=16, M=64.
    x_big = jax.random.normal(kx3, (4, 16, H), dtype=jnp.float32)
    out_big = jax.block_until_ready(residual_block(x_big, w_t, b, tm=16))
    ref_big = residual_block_ref(x_big, w_t, b)
    assert jnp.allclose(out_big, ref_big, atol=1e-5, rtol=1e-5)

    # 4) Optional bf16 matmul-operand path (looser tolerance vs f32 reference).
    out_bf16 = jax.block_until_ready(residual_block(x_big, w_t, b, use_bf16=True))
    assert jnp.allclose(out_bf16, ref_big, atol=1e-1, rtol=5e-2)

    print("KERNEL_OK")
</pallas_src>

<mosaic_0001>
module attributes {stable_mosaic.version = 11 : i64} {
  func.func @residual_block_kernel(%arg0: i32, %arg1: memref<16x128xf32, #tpu.memory_space<vmem>>, %arg2: memref<128x128xf32, #tpu.memory_space<vmem>>, %arg3: memref<1x128xf32, #tpu.memory_space<vmem>>, %arg4: memref<16x128xf32, #tpu.memory_space<vmem>>) attributes {dimension_semantics = [#tpu.dimension_semantics<parallel>], iteration_bounds = array<i64: 1>, scalar_prefetch = 0 : i64, scratch_operands = 0 : i64, tpu.core_type = #tpu.core_type<tc>, window_params = [{transform_indices = @transform_0, window_bounds = array<i64: 16, 128>}, {pipeline_mode = #tpu.pipeline_mode<synchronous>, transform_indices = @transform_1, window_bounds = array<i64: 128, 128>}, {pipeline_mode = #tpu.pipeline_mode<synchronous>, transform_indices = @transform_2, window_bounds = array<i64: 1, 128>}, {transform_indices = @transform_3, window_bounds = array<i64: 16, 128>}]} {
    %c0 = arith.constant 0 : index
    %c0_0 = arith.constant 0 : index
    %0 = vector.load %arg1[%c0, %c0_0] : memref<16x128xf32, #tpu.memory_space<vmem>>, vector<16x128xf32>
    %c0_1 = arith.constant 0 : index
    %c0_2 = arith.constant 0 : index
    %1 = vector.load %arg2[%c0_1, %c0_2] : memref<128x128xf32, #tpu.memory_space<vmem>>, vector<128x128xf32>
    %cst = arith.constant dense<0.000000e+00> : vector<16x128xf32>
    %2 = tpu.matmul %0, %1, %cst {dimension_numbers = #tpu.dot_dimension_numbers<[1], [0], [0], [1], [0, 0, 1, 1], [], []>} : vector<16x128xf32>, vector<128x128xf32>, vector<16x128xf32> -> vector<16x128xf32>
    %c0_3 = arith.constant 0 : index
    %c0_4 = arith.constant 0 : index
    %3 = vector.load %arg3[%c0_3, %c0_4] : memref<1x128xf32, #tpu.memory_space<vmem>>, vector<1x128xf32>
    %4 = vector.broadcast %3 : vector<1x128xf32> to vector<16x128xf32>
    %5 = arith.addf %2, %4 : vector<16x128xf32>
    %6 = arith.addf %5, %0 : vector<16x128xf32>
    %cst_5 = arith.constant 0.000000e+00 : f32
    %7 = vector.broadcast %cst_5 : f32 to vector<16x128xf32>
    %8 = arith.maximumf %6, %7 : vector<16x128xf32>
    %c0_6 = arith.constant 0 : index
    %c0_7 = arith.constant 0 : index
    %9 = vector.load %arg4[%c0_6, %c0_7] : memref<16x128xf32, #tpu.memory_space<vmem>>, vector<16x128xf32>
    tpu.vector_store %arg4[%c0_6, %c0_7], %8 {strides = array<i32>} : memref<16x128xf32, #tpu.memory_space<vmem>>, vector<16x128xf32>,
    return
  }
  func.func @transform_0(%arg0: i32) -> (i32, i32) {
    %c0_i32 = arith.constant 0 : i32
    %c0_i32_0 = arith.constant 0 : i32
    return %arg0, %c0_i32 : i32, i32
  }
  func.func @transform_1(%arg0: i32) -> (i32, i32) {
    %c0_i32 = arith.constant 0 : i32
    %c0_i32_0 = arith.constant 0 : i32
    %c0_i32_1 = arith.constant 0 : i32
    return %c0_i32, %c0_i32_0 : i32, i32
  }
  func.func @transform_2(%arg0: i32) -> (i32, i32) {
    %c0_i32 = arith.constant 0 : i32
    %c0_i32_0 = arith.constant 0 : i32
    %c0_i32_1 = arith.constant 0 : i32
    return %c0_i32, %c0_i32_0 : i32, i32
  }
  func.func @transform_3(%arg0: i32) -> (i32, i32) {
    %c0_i32 = arith.constant 0 : i32
    %c0_i32_0 = arith.constant 0 : i32
    return %arg0, %c0_i32 : i32, i32
  }
}

</mosaic_0001>

<bundles_post_ra>
// kernel: tpu_custom_call.1
= control target key start
LH: loop header
LB: loop body
LE: loop exit
PB: predicated region body
PF: predicated region fallthrough
CT: control target
= control target key end

     0   :  { %8 = vsyncpa [#allocation3], 0  ;;  %s338_s0 = inlined_call_operand.hbm [shape: f32[16,128], index: 0, kind: input, shape index: {}]   ;;  %s339_s1 = inlined_call_operand.hbm [shape: f32[128,128], index: 1, kind: input, shape index: {}]   ;;  %s340_s2 = inlined_call_operand.vmem [shape: f32[1,128], index: 2, kind: input, shape index: {}]   ;;  %s341_s3 = inlined_call_operand.hbm [shape: f32[16,128], index: 3, kind: output, shape index: {}]  }
   0x1   :  { %9 = vsyncpa [#allocation6], 0 }
   0x2   :  { %10 = vsyncpa [#allocation4], 0  ;;  %s292_s12 = smov [#allocation2]  }
   0x3   :  { %s16_s13 = sshll.u32 %s292_s12, 4  ;;  %s17_s13 = int_to_ptr.vmem [resolvable:$true] %s16_s13 }
   0x4   :  { %s234_s14 = scalar_lea.vmem %s17_s13, 256  ;;  %p239_p1 = scmp.lt.s32.totalorder %s17_s13, %s17_s13 }
   0x5   :  { %p235_p0 = scmp.ne.s32.totalorder %s17_s13, %s234_s14  ;;  %p240_p2 = scmp.lt.s32.totalorder %s234_s14, %s234_s14 }
   0x7   :  { %p241_p3 = por %p240_p2, %p239_p1 }
   0x9   :  { %p242_p4 = pnand %p241_p3, %p235_p0 }
   0xb   :  { %245 = shalt.err (!%p242_p4)
}
   0xc   :  { %s293_s15 = smov 128   ;;  %s294_s16 = smov 8  }
   0xd   :  { %22 = dma.hbm_to_vmem [thread:$0]  %s338_s0, 256, %s17_s13, [#allocation3], %s293_s15, %s293_s15, %s294_s16  }
   0xe   :  { %s295_s19 = smov [#allocation5]  }
   0xf   :  { %s28_s20 = sshll.u32 %s295_s19, 4  ;;  %s29_s20 = int_to_ptr.vmem [resolvable:$true] %s28_s20 }
  0x10   :  { %s254_s21 = scalar_lea.vmem %s29_s20, 2048  ;;  %p259_p6 = scmp.lt.s32.totalorder %s29_s20, %s29_s20 }
  0x11   :  { %p255_p5 = scmp.ne.s32.totalorder %s29_s20, %s254_s21  ;;  %p260_p7 = scmp.lt.s32.totalorder %s254_s21, %s254_s21 }
  0x13   :  { %p261_p8 = por %p260_p7, %p259_p6 }
  0x15   :  { %p262_p9 = pnand %p261_p8, %p255_p5 }
  0x17   :  { %265 = shalt.err (!%p262_p9)
}
  0x18   :  { %34 = dma.hbm_to_vmem [thread:$0]  %s339_s1, 2048, %s29_s20, [#allocation6], %s293_s15, %s293_s15, %s294_s16  }
  0x19   :  { %286 = dma.done.wait [#allocation3], 256  }
  0x1a   :  { %287 = vsyncadd [#allocation3], 4294967040 }
  0x1b   :  { %288 = dma.done.wait [#allocation6], 2048  }
  0x1c   :  { %289 = vsyncadd [#allocation6], 4294965248  ;;  %v60_v0 = vld [vmem:[#allocation5 + $0x78] sm:$0xff]  ;;  %v59_v1 = vld [vmem:[#allocation5 + $0x70] sm:$0xff]  ;;  %s296_s24 = smov [#allocation7]  }
  0x1d   :  { %186 = vmatprep.subr.mxu0 %v60_v0  ;;  %v58_v2 = vld [vmem:[#allocation5 + $0x68] sm:$0xff]  ;;  %v57_v3 = vld [vmem:[#allocation5 + $0x60] sm:$0xff]  ;;  %v43_v4 = vld [vmem:[#allocation2] sm:$0xff]  ;;  %s154_s25 = sshll.u32 %s296_s24, 4  ;;  %s155_s25 = int_to_ptr.vmem [resolvable:$true] %s154_s25 }
  0x1e   :  { %187 = vmatpush3.msra.mxu0 %v60_v0  ;;  %v56_v5 = vld [vmem:[#allocation5 + $0x58] sm:$0xff]  ;;  %218 = vmatprep.mubr.f32.mxu0 %v43_v4  ;;  %v55_v6 = vld [vmem:[#allocation5 + $0x50] sm:$0xff]  ;;  %v54_v7 = vld [vmem:[#allocation5 + $0x48] sm:$0xff]  ;;  %s266_s26 = scalar_lea.vmem %s155_s25, 256  ;;  %p271_p11 = scmp.lt.s32.totalorder %s155_s25, %s155_s25 }
  0x1f   :  { %188 = vmatprep.subr.mxu0 %v59_v1  ;;  %v53_v8 = vld [vmem:[#allocation5 + $0x40] sm:$0xff]  ;;  %v52_v9 = vld [vmem:[#allocation5 + $0x38] sm:$0xff]  ;;  %v51_v10 = vld [vmem:[#allocation5 + $0x30] sm:$0xff]  ;;  %p267_p10 = scmp.ne.s32.totalorder %s155_s25, %s266_s26  ;;  %p272_p12 = scmp.lt.s32.totalorder %s266_s26, %s266_s26 }
  0x20   :  { %189 = vmatpush3.msra.mxu0 %v59_v1  ;;  %v50_v11 = vld [vmem:[#allocation5 + $0x28] sm:$0xff]  ;;  %v49_v12 = vld [vmem:[#allocation5 + $0x20] sm:$0xff]  ;;  %v48_v13 = vld [vmem:[#allocation5 + $0x18] sm:$0xff] }
  0x21   :  { %190 = vmatprep.subr.mxu0 %v58_v2  ;;  %v47_v14 = vld [vmem:[#allocation5 + $0x10] sm:$0xff]  ;;  %v46_v15 = vld [vmem:[#allocation5 + $0x8] sm:$0xff]  ;;  %v45_v16 = vld [vmem:[#allocation5] sm:$0xff]  ;;  %p273_p13 = por %p272_p12, %p271_p11 }
  0x22   :  { %191 = vmatpush3.msra.mxu0 %v58_v2  ;;  %v44_v17 = vld [vmem:[#allocation2 + $0x8] sm:$0xff]  ;;  %v167_v18 = vld [vmem:[%s340_s2] ss:$0 sm:$0xff] }
  0x23   :  { %192 = vmatprep.subr.mxu0 %v57_v3  ;;  %p274_p0 = pnand %p273_p13, %p267_p10 }
  0x24   :  { %193 = vmatpush3.msra.mxu0 %v57_v3 }
  0x25   :  { %194 = vmatprep.subr.mxu0 %v56_v5 }
  0x26   :  { %195 = vmatpush3.msra.mxu0 %v56_v5 }
  0x27   :  { %196 = vmatprep.subr.mxu0 %v55_v6 }
  0x28   :  { %197 = vmatpush3.msra.mxu0 %v55_v6 }
  0x29   :  { %198 = vmatprep.subr.mxu0 %v54_v7 }
  0x2a   :  { %199 = vmatpush3.msra.mxu0 %v54_v7 }
  0x2b   :  { %200 = vmatprep.subr.mxu0 %v53_v8 }
  0x2c   :  { %201 = vmatpush3.msra.mxu0 %v53_v8 }
  0x2d   :  { %202 = vmatprep.subr.mxu0 %v52_v9 }
  0x2e   :  { %203 = vmatpush3.msra.mxu0 %v52_v9 }
  0x2f   :  { %204 = vmatprep.subr.mxu0 %v51_v10 }
  0x30   :  { %205 = vmatpush3.msra.mxu0 %v51_v10 }
  0x31   :  { %206 = vmatprep.subr.mxu0 %v50_v11 }
  0x32   :  { %207 = vmatpush3.msra.mxu0 %v50_v11 }
  0x33   :  { %208 = vmatprep.subr.mxu0 %v49_v12 }
  0x34   :  { %209 = vmatpush3.msra.mxu0 %v49_v12 }
  0x35   :  { %210 = vmatprep.subr.mxu0 %v48_v13 }
  0x36   :  { %211 = vmatpush3.msra.mxu0 %v48_v13 }
  0x37   :  { %212 = vmatprep.subr.mxu0 %v47_v14 }
  0x38   :  { %213 = vmatpush3.msra.mxu0 %v47_v14 }
  0x39   :  { %214 = vmatprep.subr.mxu0 %v46_v15 }
  0x3a   :  { %215 = vmatpush3.msra.mxu0 %v46_v15 }
  0x3b   :  { %216 = vmatprep.subr.mxu0 %v45_v16 }
  0x3c   :  { %217 = vmatpush3.msra.mxu0 %v45_v16 }
  0x3d   :  { %219 = vmatmul.mubr.f32.vlgmr.msra.gmra.mxu0 %v44_v17 }
  0xfd   :  { %v220_v19 = vpop.f32.mrf.mxu0 }
  0xfe   :  { %v140_v20 = vadd.f32 %v220_v19, %v167_v18 }
  0xff   :  { %v134_v21 = vpop.f32.mrf.mxu0 }
 0x100   :  { %v144_v22 = vadd.f32 %v140_v20, %v44_v17  ;;  %v135_v23 = vadd.f32 %v167_v18, %v134_v21 }
 0x102   :  { %v146_v24 = vmax.f32 %v144_v22, 0.0  ;;  %v143_v25 = vadd.f32 %v135_v23, %v43_v4 }
 0x104   :  { %148 = vst [vmem:[#allocation7 + $0x8] sm:$0xff] %v146_v24  ;;  %v145_v26 = vmax.f32 %v143_v25, 0.0 }
 0x106   :  { %147 = vst [vmem:[#allocation7] sm:$0xff] %v145_v26 }
 0x107   :  { %277 = shalt.err (!%p274_p0)
}
 0x108   :  { %160 = dma.vmem_to_hbm [thread:$0]  %s155_s25, 256, %s341_s3, [#allocation4], %s293_s15, %s293_s15, %s294_s16  }
 0x109   :  { %290 = dma.done.wait [#allocation4], 256  }
 0x10a   :  { %291 = vsyncadd [#allocation4], 4294967040 }
 0x10b   :  { %164 = vsyncpa [#allocation3], 1 }
 0x10c   :  { %165 = vsyncpa [#allocation6], 1 }
 0x10d   :  { %166 = vsyncpa [#allocation4], 1 }

</bundles_post_ra>
